<compile_context>
chip_gen: v6e
topology: v6e:2x2x1
jax: 0.10.0
libtpu: 0.0.40
codegen_flags: <defaults>
</compile_context>

<pallas_src>
import math
from functools import partial

import numpy as np
import jax
import jax.numpy as jnp
from jax.experimental import pallas as pl
from jax.experimental.pallas import tpu as pltpu


_MAX_ROW_BLOCK = 2048            # cap on packed rows per output tile
_MAX_COL_BLOCK = 2048            # cap on lanes per output tile (multiple of 128)
_TILE_VMEM_BUDGET = 8 * 1024 * 1024   # bytes for the 2 double-buffered out tiles
                                       # (fits v5e's 16 MiB scoped default and
                                       #  leaves headroom on v7x's 64 MiB VMEM)


def _make_group_kernel(batch_size: int, gr: int, row_block: int):
    """Writes the packed slab for one (param g, row-tile i, col-tile j) block.

    Packed layout: stored element (g, R, C) holds mask value at
        original_row r = R*gr + C // n_cols,   column c = C % n_cols
    value = 0 iff r // batch == col_start[g] + c, else 1.
    The C-only part of the test is precomputed into h[C] = C//n_cols - batch*(C%n_cols),
    so in-kernel it is: d = r - batch*(col_start + c) = R*gr - batch*col_start + h[C];
    hit  <=>  0 <= d < batch.   (No vector integer division anywhere.)
    """

    def kernel(col_starts_ref, h_ref, o_ref):
        g = pl.program_id(0)
        i = pl.program_id(1)
        col_start = col_starts_ref[g]                        # SMEM scalar read
        # packed-row index of every element of this tile
        s = jax.lax.broadcasted_iota(jnp.int32, o_ref.shape, 1) + i * row_block
        h = h_ref[...].reshape(1, 1, h_ref.shape[-1])        # (1,1,col_block)
        d = s * gr + (h - batch_size * col_start)
        hit = jnp.logical_and(d >= 0, d < batch_size)
        o_ref[...] = (1 - hit.astype(jnp.int32)).astype(o_ref.dtype)

    return kernel


def _plan_group_layout(n_cols, batch_size, total_rows, itemsize, n_params):
    """Pick (gr, lane, r_out, row_block, col_block) for one n_cols group."""
    # Lane-dense packing: pack `gr` original rows per stored row so the stored
    # last dim is a multiple of 128 lanes whenever n_cols is narrow/unaligned.
    if n_cols % 128 == 0 or n_cols >= 1024:
        gr = 1                                   # already (nearly) lane-dense
    else:
        gr = 128 // math.gcd(n_cols, 128)
    lane = gr * n_cols
    r_out = -(-total_rows // gr)                 # packed (possibly padded) rows

    col_block = lane if lane <= _MAX_COL_BLOCK else _MAX_COL_BLOCK

    budget_rows = _TILE_VMEM_BUDGET // (2 * col_block * itemsize)
    row_cap = min(_MAX_ROW_BLOCK, max(32, (budget_rows // 32) * 32))
    row_block = r_out if r_out <= row_cap else row_cap

    # v7x megacore: a pure HBM-writeback kernel with a (1,1,1) grid leaves one
    # TensorCore idle — split rows in two when there is enough work.
    n_blocks = n_params * (-(-r_out // row_block)) * (-(-lane // col_block))
    if n_blocks == 1 and r_out >= 64:
        row_block = ((-(-r_out // 2)) + 31) // 32 * 32

    return gr, lane, r_out, row_block, col_block


@partial(jax.jit, static_argnames=(
    "batch_size", "total_rows", "n_cols", "gr", "lane",
    "row_block", "col_block", "head_shapes", "out_dtype"))
def _build_group_slabs(col_starts, h, *, batch_size, total_rows, n_cols, gr,
                       lane, row_block, col_block, head_shapes, out_dtype):
    """One pallas_call producing the slabs of every param in this n_cols group."""
    n_params = len(head_shapes)
    r_out = -(-total_rows // gr)
    grid = (n_params, pl.cdiv(r_out, row_block), pl.cdiv(lane, col_block))
    kernel = _make_group_kernel(batch_size, gr, row_block)

    packed = pl.pallas_call(
        kernel,
        out_shape=jax.ShapeDtypeStruct((n_params, r_out, lane), out_dtype),
        grid_spec=pltpu.PrefetchScalarGridSpec(
            num_scalar_prefetch=1,           # col_starts -> SMEM, reused executable
            grid=grid,
            in_specs=[pl.BlockSpec((1, col_block), lambda g, i, j, cs: (0, j))],
            out_specs=pl.BlockSpec((1, row_block, col_block),
                                   lambda g, i, j, cs: (g, i, j)),
        ),
        compiler_params=pltpu.CompilerParams(
            dimension_semantics=("parallel", "parallel", "parallel")),
    )(col_starts, h)

    # Unpack: (r_out, lane) --row-major reshape--> (r_out*gr, n_cols); drop the
    # (all-ones) padding rows when gr does not divide total_rows; reshape to
    # the torch layout (batch*N, *ts.shape[:-1]).
    slabs = []
    for g, head in enumerate(head_shapes):
        rows = packed[g].reshape(r_out * gr, n_cols)
        rows = rows[:total_rows]                 # no-op slice when not padded
        slabs.append(rows.reshape((total_rows,) + head))
    return tuple(slabs)


class SingleComponentMaskSamplerPallas:
    """JAX/Pallas port of mask_samplers.AblationMaskSampler.SingleComponentMaskSampler."""

    def __init__(self, init_params, batch_size, mask_dtype=jnp.bfloat16):
        # init_params: dict[str, list[jnp.ndarray]]  (only shapes matter)
        # mask_dtype: bfloat16 is exact for 0/1 masks and halves writeback
        #             bytes; pass jnp.float32 to match torch bit-for-bit.
        self.use_temperature = False
        self.log_columns = []

        entries = []                 # (key, list_idx, col_start, n_cols, head_shape)
        n_components = 0
        for k in init_params:
            for idx, ts in enumerate(init_params[k]):
                n = int(ts.size)
                head = tuple(int(d) for d in ts.shape[:-1])
                # Same implicit constraint as the torch reshape — make it explicit.
                assert math.prod(head) == n, (
                    "mask reshape assumes the last param dim is 1, got shape "
                    f"{tuple(ts.shape)}")
                entries.append((k, idx, n_components, n, head))
                n_components += n
        self.n_components = n_components

        total_rows = n_components * batch_size
        assert 0 < total_rows < 2 ** 30, "row indices would overflow int32 math"

        itemsize = jnp.dtype(mask_dtype).itemsize

        # Group params by n_cols: one pallas_call / compile / dispatch per group.
        groups = {}
        for e in entries:
            groups.setdefault(e[3], []).append(e)

        self.sampled_mask = {k: [None] * len(init_params[k]) for k in init_params}
        for n_cols, group in groups.items():
            gr, lane, r_out, row_block, col_block = _plan_group_layout(
                n_cols, batch_size, total_rows, itemsize, len(group))

            col_starts = jnp.asarray(
                np.array([e[2] for e in group], dtype=np.int32))
            c_idx = np.arange(lane, dtype=np.int64)
            h_np = (c_idx // n_cols - batch_size * (c_idx % n_cols)).astype(np.int32)
            h = jnp.asarray(h_np.reshape(1, lane))
            head_shapes = tuple(e[4] for e in group)

            slabs = _build_group_slabs(
                col_starts, h,
                batch_size=batch_size, total_rows=total_rows, n_cols=n_cols,
                gr=gr, lane=lane, row_block=row_block, col_block=col_block,
                head_shapes=head_shapes, out_dtype=mask_dtype)

            for e, slab in zip(group, slabs):
                self.sampled_mask[e[0]][e[1]] = slab

    def forward(self):
        return (0, {})

    def __call__(self):
        return self.forward()

    def record_state(self, j):
        pass


if __name__ == "__main__":
    key = jax.random.PRNGKey(0)
    k1, k2, k3 = jax.random.split(key, 3)

    # Small, deterministic "pruning_cfg.init_params": tensors whose last dim
    # is 1 (as in the original pruning configs), so nelement == prod(shape[:-1]).
    init_params = {
        "attn": [
            jax.random.normal(k1, (4, 1), dtype=jnp.float32),
            jax.random.normal(k2, (4, 1), dtype=jnp.float32),
        ],
        "mlp": [
            jax.random.normal(k3, (8, 1), dtype=jnp.float32),
        ],
    }
    batch_size = 2  # pruning_cfg.batch_size

    sampler = SingleComponentMaskSamplerPallas(init_params, batch_size)

    # Block on all kernel-produced masks.
    for k in sampler.sampled_mask:
        for m in sampler.sampled_mask[k]:
            jax.block_until_ready(m)

    # Correctness check against a pure-JAX reference.
    N = sampler.n_components
    comp_mask = jnp.ones((N, N), jnp.float32) - jnp.eye(N, dtype=jnp.float32)
    repeated = jnp.repeat(comp_mask, batch_size, axis=0)     # 't c -> (t b) c'
    start = 0
    ok = True
    for k in init_params:
        for idx, ts in enumerate(init_params[k]):
            n = int(ts.size)
            ref = repeated[:, start:start + n].reshape(
                (batch_size * N,) + tuple(ts.shape[:-1]))
            got = sampler.sampled_mask[k][idx]
            ok = ok and (got.shape == ref.shape)
            ok = ok and bool(jnp.array_equal(got.astype(jnp.float32), ref))
            start += n

    fwd = sampler()          # forward() == (0, {})
    assert fwd == (0, {})
    assert ok

    print("KERNEL_OK")
</pallas_src>

<mosaic_0001>
module attributes {stable_mosaic.version = 11 : i64} {
  func.func @kernel(%arg0: i32, %arg1: i32, %arg2: i32, %arg3: memref<2xi32, #tpu.memory_space<smem>>, %arg4: memref<1x128xi32, #tpu.memory_space<vmem>>, %arg5: memref<1x1x128xbf16, #tpu.memory_space<vmem>>) attributes {dimension_semantics = [#tpu.dimension_semantics<parallel>, #tpu.dimension_semantics<parallel>, #tpu.dimension_semantics<parallel>], iteration_bounds = array<i64: 2, 1, 1>, scalar_prefetch = 1 : i64, scratch_operands = 0 : i64, tpu.core_type = #tpu.core_type<tc>, window_params = [{transform_indices = @transform_0, window_bounds = array<i64: 1, 128>}, {transform_indices = @transform_1, window_bounds = array<i64: 1, 1, 128>}]} {
    %0 = arith.index_cast %arg0 : i32 to index
    %1 = memref.load %arg3[%0] : memref<2xi32, #tpu.memory_space<smem>>
    %2 = tpu.iota {dimensions = array<i32: 1>} : vector<1x1x128xi32>
    %c1_i32 = arith.constant 1 : i32
    %3 = arith.muli %arg1, %c1_i32 : i32
    %4 = vector.broadcast %3 : i32 to vector<1x1x128xi32>
    %5 = arith.addi %2, %4 : vector<1x1x128xi32>
    %c0 = arith.constant 0 : index
    %c0_0 = arith.constant 0 : index
    %6 = vector.load %arg4[%c0, %c0_0] : memref<1x128xi32, #tpu.memory_space<vmem>>, vector<1x128xi32>
    %7 = vector.shape_cast %6 : vector<1x128xi32> to vector<1x1x128xi32>
    %c32_i32 = arith.constant 32 : i32
    %8 = vector.broadcast %c32_i32 : i32 to vector<1x1x128xi32>
    %9 = arith.muli %5, %8 : vector<1x1x128xi32>
    %c2_i32 = arith.constant 2 : i32
    %10 = arith.muli %c2_i32, %1 : i32
    %11 = vector.broadcast %10 : i32 to vector<1x1x128xi32>
    %12 = arith.subi %7, %11 : vector<1x1x128xi32>
    %13 = arith.addi %9, %12 : vector<1x1x128xi32>
    %c0_i32 = arith.constant 0 : i32
    %14 = vector.broadcast %c0_i32 : i32 to vector<1x1x128xi32>
    %15 = arith.cmpi sge, %13, %14 : vector<1x1x128xi32>
    %c2_i32_1 = arith.constant 2 : i32
    %16 = vector.broadcast %c2_i32_1 : i32 to vector<1x1x128xi32>
    %17 = arith.cmpi slt, %13, %16 : vector<1x1x128xi32>
    %18 = arith.andi %15, %17 : vector<1x1x128xi1>
    %19 = arith.extui %18 : vector<1x1x128xi1> to vector<1x1x128xi32>
    %c1_i32_2 = arith.constant 1 : i32
    %20 = vector.broadcast %c1_i32_2 : i32 to vector<1x1x128xi32>
    %21 = arith.subi %20, %19 : vector<1x1x128xi32>
    %22 = arith.sitofp %21 : vector<1x1x128xi32> to vector<1x1x128xbf16>
    %c0_3 = arith.constant 0 : index
    %c0_4 = arith.constant 0 : index
    %c0_5 = arith.constant 0 : index
    %23 = vector.load %arg5[%c0_3, %c0_4, %c0_5] : memref<1x1x128xbf16, #tpu.memory_space<vmem>>, vector<1x1x128xbf16>
    tpu.vector_store %arg5[%c0_3, %c0_4, %c0_5], %22 {strides = array<i32>} : memref<1x1x128xbf16, #tpu.memory_space<vmem>>, vector<1x1x128xbf16>,
    return
  }
  func.func @transform_0(%arg0: i32, %arg1: i32, %arg2: i32, %arg3: memref<2xi32, #tpu.memory_space<smem>>) -> (i32, i32) {
    %c0_i32 = arith.constant 0 : i32
    %c0_i32_0 = arith.constant 0 : i32
    return %c0_i32, %arg2 : i32, i32
  }
  func.func @transform_1(%arg0: i32, %arg1: i32, %arg2: i32, %arg3: memref<2xi32, #tpu.memory_space<smem>>) -> (i32, i32, i32) {
    %c0_i32 = arith.constant 0 : i32
    return %arg0, %arg1, %arg2 : i32, i32, i32
  }
}

</mosaic_0001>

<bundles_post_ra>
// kernel: squeeze.3
= control target key start
LH: loop header
LB: loop body
LE: loop exit
PB: predicated region body
PF: predicated region fallthrough
CT: control target
= control target key end

     0   :  { %s289_s8 = smov 116   ;;  %s290_s9 = smov 120   ;;  %vm20_vm0 = vcmask 31744   ;;  %s370_s0 = inlined_call_operand.vmem [shape: bf16[128], index: 0, kind: input, shape index: {}]   ;;  %s371_s1 = inlined_call_operand.vmem [shape: bf16[32,4], index: 1, kind: output, shape index: {}]  }
   0x1   :  { %v15_v0 = vld [vmem:[%s370_s0] sm:$0x1]  ;;  %s288_s0 = smov 124   ;;  %s291_s10 = smov 112  }
   0x2   :  { %v16_v1 = vunpack.c.l.bf16 %v15_v0  ;;  %s292_s11 = smov 108   ;;  %s293_s12 = smov 104  }
   0x3   :  { %s294_s13 = smov 100   ;;  %s295_s14 = smov 96  }
   0x4   :  { %18 = vst [vmem:[#allocation1] sm:$0x3] %v16_v1  ;;  %s296_s15 = smov 92   ;;  %s297_s16 = smov 88  }
   0x5   :  { %s298_s17 = smov 84   ;;  %s299_s18 = smov 80  }
   0x6   :  { %s300_s19 = smov 76   ;;  %s301_s20 = smov 72  }
   0x7   :  { %s302_s21 = smov 68   ;;  %s303_s22 = smov 64  }
   0x8   :  { %s304_s23 = smov 60   ;;  %s305_s24 = smov 56  }
   0x9   :  { %s306_s25 = smov 52   ;;  %s307_s26 = smov 48  }
   0xa   :  { %s308_s27 = smov 44   ;;  %s309_s28 = smov 40  }
   0xb   :  { %v22_v2 = vld [vmem:[#allocation1] sm:$0x1]   ;;  %s310_s29 = smov 36   ;;  %s311_s30 = smov 32  }
   0xc   :  { %v34_v3 = vld [vmem:[#allocation1] sm:$0x1]   ;;  %23 = vrot.lane.b32.xlu0 %v22_v2, %s288_s0  ;;  %s312_s2 = smov 28   ;;  %s313_s3 = smov 24  }
   0xd   :  { %35 = vrot.lane.b32.xlu1 %v34_v3, %s289_s8  ;;  %v28_v4 = vld [vmem:[#allocation1] sm:$0x1]   ;;  %s314_s4 = smov 20   ;;  %s315_s5 = smov 16  }
   0xe   :  { %v40_v5 = vld [vmem:[#allocation1] sm:$0x1]   ;;  %s316_s6 = smov 12   ;;  %s317_s7 = smov 8  }
   0xf   :  { %v46_v6 = vld [vmem:[#allocation1] sm:$0x1]   ;;  %s318_s0 = smov 4  }
  0x10   :  { %29 = vrot.lane.b32.xlu0 %v28_v4, %s290_s9  ;;  %v52_v7 = vld [vmem:[#allocation1] sm:$0x1]  }
  0x11   :  { %41 = vrot.lane.b32.xlu1 %v40_v5, %s291_s10  ;;  %v58_v8 = vld [vmem:[#allocation1] sm:$0x1]  }
  0x12   :  { %v64_v9 = vld [vmem:[#allocation1] sm:$0x1]  }
  0x13   :  { %v19_v10 = vld [vmem:[#allocation1] sm:$0x1]  }
  0x14   :  { %47 = vrot.lane.b32.xlu0 %v46_v6, %s292_s11  ;;  %21 = vst.msk [vmem:[#allocation0] sm:$0x1] %vm20_vm0, %v19_v10   ;;  %v70_v11 = vld [vmem:[#allocation1] sm:$0x1]  }
  0x15   :  { %53 = vrot.lane.b32.xlu1 %v52_v7, %s293_s12  ;;  %v76_v12 = vld [vmem:[#allocation1] sm:$0x1]  }
  0x16   :  { %v82_v13 = vld [vmem:[#allocation1] sm:$0x1]  }
  0x17   :  { %v88_v14 = vld [vmem:[#allocation1] sm:$0x1]  }
  0x18   :  { %59 = vrot.lane.b32.xlu0 %v58_v8, %s294_s13  ;;  %v94_v15 = vld [vmem:[#allocation1] sm:$0x1]  }
  0x19   :  { %65 = vrot.lane.b32.xlu1 %v64_v9, %s295_s14  ;;  %v100_v16 = vld [vmem:[#allocation1] sm:$0x1]  }
  0x1a   :  { %v106_v17 = vld [vmem:[#allocation1] sm:$0x1]  }
  0x1b   :  { %v112_v18 = vld [vmem:[#allocation1] sm:$0x1]  }
  0x1c   :  { %71 = vrot.lane.b32.xlu0 %v70_v11, %s296_s15  ;;  %v118_v19 = vld [vmem:[#allocation1] sm:$0x1]  }
  0x1d   :  { %77 = vrot.lane.b32.xlu1 %v76_v12, %s297_s16  ;;  %v124_v20 = vld [vmem:[#allocation1] sm:$0x1]  }
  0x1e   :  { %v130_v21 = vld [vmem:[#allocation1] sm:$0x1]  }
  0x1f   :  { %v136_v22 = vld [vmem:[#allocation1] sm:$0x1]  }
  0x20   :  { %83 = vrot.lane.b32.xlu0 %v82_v13, %s298_s17  ;;  %v142_v23 = vld [vmem:[#allocation1] sm:$0x1]  }
  0x21   :  { %89 = vrot.lane.b32.xlu1 %v88_v14, %s299_s18  ;;  %v148_v24 = vld [vmem:[#allocation1] sm:$0x1]  }
  0x22   :  { %v154_v25 = vld [vmem:[#allocation1] sm:$0x1]  }
  0x23   :  { %v160_v26 = vld [vmem:[#allocation1] sm:$0x1]  }
  0x24   :  { %95 = vrot.lane.b32.xlu0 %v94_v15, %s300_s19  ;;  %v166_v27 = vld [vmem:[#allocation1] sm:$0x1]  }
  0x25   :  { %101 = vrot.lane.b32.xlu1 %v100_v16, %s301_s20  ;;  %v172_v28 = vld [vmem:[#allocation1] sm:$0x1]  }
  0x26   :  { %v178_v29 = vld [vmem:[#allocation1] sm:$0x1]  }
  0x27   :  { %v184_v30 = vld [vmem:[#allocation1] sm:$0x1]  }
  0x28   :  { %107 = vrot.lane.b32.xlu0 %v106_v17, %s302_s21  ;;  %v190_v31 = vld [vmem:[#allocation1] sm:$0x1]  }
  0x29   :  { %113 = vrot.lane.b32.xlu1 %v112_v18, %s303_s22  ;;  %v196_v32 = vld [vmem:[#allocation1] sm:$0x1]  }
  0x2a   :  { %v202_v33 = vld [vmem:[#allocation1] sm:$0x1]  }
  0x2c   :  { %119 = vrot.lane.b32.xlu0 %v118_v19, %s304_s23 }
  0x2d   :  { %125 = vrot.lane.b32.xlu1 %v124_v20, %s305_s24 }
  0x30   :  { %131 = vrot.lane.b32.xlu0 %v130_v21, %s306_s25 }
  0x31   :  { %137 = vrot.lane.b32.xlu1 %v136_v22, %s307_s26 }
  0x34   :  { %143 = vrot.lane.b32.xlu0 %v142_v23, %s308_s27 }
  0x35   :  { %149 = vrot.lane.b32.xlu1 %v148_v24, %s309_s28 }
  0x38   :  { %155 = vrot.lane.b32.xlu0 %v154_v25, %s310_s29 }
  0x39   :  { %161 = vrot.lane.b32.xlu1 %v160_v26, %s311_s30 }
  0x3c   :  { %167 = vrot.lane.b32.xlu0 %v166_v27, %s312_s2 }
  0x3d   :  { %173 = vrot.lane.b32.xlu1 %v172_v28, %s313_s3 }
  0x40   :  { %179 = vrot.lane.b32.xlu0 %v178_v29, %s314_s4 }
  0x41   :  { %185 = vrot.lane.b32.xlu1 %v184_v30, %s315_s5 }
  0x44   :  { %191 = vrot.lane.b32.xlu0 %v190_v31, %s316_s6 }
  0x45   :  { %197 = vrot.lane.b32.xlu1 %v196_v32, %s317_s7 }
  0x48   :  { %203 = vrot.lane.b32.xlu0 %v202_v33, %s318_s0 }
  0x7e   :  { %v24_v34 = vpop.permute.xlu0 %23  }
  0x7f   :  { %v36_v35 = vpop.permute.xlu1 %35   ;;  %27 = vst.msk [vmem:[#allocation0 + $0x1] sm:$0x1] %vm20_vm0, %v24_v34  }
  0x80   :  { %39 = vst.msk [vmem:[#allocation0 + $0x3] sm:$0x1] %vm20_vm0, %v36_v35  }
  0x82   :  { %v30_v36 = vpop.permute.xlu0 %29  }
  0x83   :  { %v42_v37 = vpop.permute.xlu1 %41   ;;  %33 = vst.msk [vmem:[#allocation0 + $0x2] sm:$0x1] %vm20_vm0, %v30_v36  }
  0x84   :  { %45 = vst.msk [vmem:[#allocation0 + $0x4] sm:$0x1] %vm20_vm0, %v42_v37  }
  0x86   :  { %v48_v38 = vpop.permute.xlu0 %47  }
  0x87   :  { %v54_v39 = vpop.permute.xlu1 %53   ;;  %51 = vst.msk [vmem:[#allocation0 + $0x5] sm:$0x1] %vm20_vm0, %v48_v38  }
  0x88   :  { %57 = vst.msk [vmem:[#allocation0 + $0x6] sm:$0x1] %vm20_vm0, %v54_v39  }
  0x8a   :  { %v60_v40 = vpop.permute.xlu0 %59  }
  0x8b   :  { %v66_v41 = vpop.permute.xlu1 %65   ;;  %63 = vst.msk [vmem:[#allocation0 + $0x7] sm:$0x1] %vm20_vm0, %v60_v40  }
  0x8c   :  { %69 = vst.msk [vmem:[#allocation0 + $0x8] sm:$0x1] %vm20_vm0, %v66_v41  }
  0x8e   :  { %v72_v42 = vpop.permute.xlu0 %71  }
  0x8f   :  { %v78_v43 = vpop.permute.xlu1 %77   ;;  %75 = vst.msk [vmem:[#allocation0 + $0x9] sm:$0x1] %vm20_vm0, %v72_v42  }
  0x90   :  { %81 = vst.msk [vmem:[#allocation0 + $0xa] sm:$0x1] %vm20_vm0, %v78_v43  }
  0x92   :  { %v84_v44 = vpop.permute.xlu0 %83   ;;  %v213_v52 = vld [vmem:[#allocation0] sm:$0xff] }
  0x93   :  { %v90_v45 = vpop.permute.xlu1 %89   ;;  %87 = vst.msk [vmem:[#allocation0 + $0xb] sm:$0x1] %vm20_vm0, %v84_v44  }
  0x94   :  { %93 = vst.msk [vmem:[#allocation0 + $0xc] sm:$0x1] %vm20_vm0, %v90_v45  }
  0x96   :  { %v96_v46 = vpop.permute.xlu0 %95  }
  0x97   :  { %v102_v47 = vpop.permute.xlu1 %101   ;;  %99 = vst.msk [vmem:[#allocation0 + $0xd] sm:$0x1] %vm20_vm0, %v96_v46  }
  0x98   :  { %105 = vst.msk [vmem:[#allocation0 + $0xe] sm:$0x1] %vm20_vm0, %v102_v47  }
  0x9a   :  { %v108_v48 = vpop.permute.xlu0 %107  }
  0x9b   :  { %v114_v49 = vpop.permute.xlu1 %113   ;;  %111 = vst.msk [vmem:[#allocation0 + $0xf] sm:$0x1] %vm20_vm0, %v108_v48  }
  0x9c   :  { %117 = vst.msk [vmem:[#allocation0 + $0x10] sm:$0x1] %vm20_vm0, %v114_v49  }
  0x9e   :  { %v120_v50 = vpop.permute.xlu0 %119  }
  0x9f   :  { %v126_v51 = vpop.permute.xlu1 %125   ;;  %123 = vst.msk [vmem:[#allocation0 + $0x11] sm:$0x1] %vm20_vm0, %v120_v50  }
  0xa0   :  { %129 = vst.msk [vmem:[#allocation0 + $0x12] sm:$0x1] %vm20_vm0, %v126_v51  }
  0xa2   :  { %v219_v53 = vld [vmem:[#allocation0 + $0x8] sm:$0xff]  ;;  %v132_v54 = vpop.permute.xlu0 %131  }
  0xa3   :  { %v138_v55 = vpop.permute.xlu1 %137   ;;  %v249_v56 = vpack.c.bf16 %v219_v53, %v213_v52  ;;  %135 = vst.msk [vmem:[#allocation0 + $0x13] sm:$0x1] %vm20_vm0, %v132_v54  }
  0xa4   :  { %141 = vst.msk [vmem:[#allocation0 + $0x14] sm:$0x1] %vm20_vm0, %v138_v55  }
  0xa5   :  { %250 = vst [vmem:[%s371_s1] sm:$0xff] %v249_v56  }
  0xa6   :  { %v144_v57 = vpop.permute.xlu0 %143  }
  0xa7   :  { %v150_v58 = vpop.permute.xlu1 %149   ;;  %147 = vst.msk [vmem:[#allocation0 + $0x15] sm:$0x1] %vm20_vm0, %v144_v57  }
  0xa8   :  { %153 = vst.msk [vmem:[#allocation0 + $0x16] sm:$0x1] %vm20_vm0, %v150_v58  }
  0xaa   :  { %v156_v59 = vpop.permute.xlu0 %155  }
  0xab   :  { %v162_v60 = vpop.permute.xlu1 %161   ;;  %159 = vst.msk [vmem:[#allocation0 + $0x17] sm:$0x1] %vm20_vm0, %v156_v59  }
  0xac   :  { %165 = vst.msk [vmem:[#allocation0 + $0x18] sm:$0x1] %vm20_vm0, %v162_v60  }
  0xae   :  { %v168_v61 = vpop.permute.xlu0 %167  }
  0xaf   :  { %v174_v62 = vpop.permute.xlu1 %173   ;;  %171 = vst.msk [vmem:[#allocation0 + $0x19] sm:$0x1] %vm20_vm0, %v168_v61  }
  0xb0   :  { %177 = vst.msk [vmem:[#allocation0 + $0x1a] sm:$0x1] %vm20_vm0, %v174_v62  }
  0xb2   :  { %v180_v63 = vpop.permute.xlu0 %179   ;;  %v226_v4 = vld [vmem:[#allocation0 + $0x10] sm:$0xff] }
  0xb3   :  { %v186_v0 = vpop.permute.xlu1 %185   ;;  %183 = vst.msk [vmem:[#allocation0 + $0x1b] sm:$0x1] %vm20_vm0, %v180_v63  }
  0xb4   :  { %189 = vst.msk [vmem:[#allocation0 + $0x1c] sm:$0x1] %vm20_vm0, %v186_v0  }
  0xb6   :  { %v192_v1 = vpop.permute.xlu0 %191  }
  0xb7   :  { %v198_v2 = vpop.permute.xlu1 %197   ;;  %195 = vst.msk [vmem:[#allocation0 + $0x1d] sm:$0x1] %vm20_vm0, %v192_v1  }
  0xb8   :  { %201 = vst.msk [vmem:[#allocation0 + $0x1e] sm:$0x1] %vm20_vm0, %v198_v2  }
  0xba   :  { %v204_v3 = vpop.permute.xlu0 %203  }
  0xbb   :  { %207 = vst.msk [vmem:[#allocation0 + $0x1f] sm:$0x1] %vm20_vm0, %v204_v3  }
  0xc2   :  { %v234_v5 = vld [vmem:[#allocation0 + $0x18] sm:$0xff] }
  0xc3   :  { %v254_v6 = vpack.c.bf16 %v234_v5, %v226_v4 }
  0xc5   :  { %256 = vst [vmem:[%s371_s1 + $0x8] sm:$0xff] %v254_v6  }

// kernel: _build_group_slabs.1
= control target key start
LH: loop header
LB: loop body
LE: loop exit
PB: predicated region body
PF: predicated region fallthrough
CT: control target
= control target key end

     0   :  { %s318_s9 = smov [#allocation3]   ;;  %s371_s0 = inlined_call_operand.hbm [shape: s32[2], index: 0, kind: input, shape index: {}]   ;;  %s372_s1 = inlined_call_operand.vmem [shape: s32[1,128], index: 1, kind: input, shape index: {}]   ;;  %s373_s2 = inlined_call_operand.vmem [shape: bf16[2,1,128], index: 2, kind: output, shape index: {}]  }
   0x1   :  { %8 = dma.hbm_to_smem %s371_s0, 16, %s318_s9, [#allocation2] }
   0x2   :  { %304 = dma.done.wait [#allocation2], 16 }
   0x3   :  { %305 = vsyncadd [#allocation2], 4294967280 }
   0x4   :  { %10 = sfence }
   0x5   :  { %s338_s12 = smov 0   ;;  %s340_s13 = smov 0  }
   0x6   :  { %s342_s14 = smov 0  }
   0x7 LB: > { %s35_s0 = sadd.s32 1, %s312_s13  ;;  %p254_p0 = scmp.ge.s32.totalorder %s316_s14, 1  ;;  %s316_s14 = sphi %s342_s14, %s16_s14   ;;  %s312_s13 = sphi %s340_s13, %s375_s13   ;;  %s308_s12 = sphi %s338_s12, %s374_s12  }
   0x8   : > { %p37_p1 = scmp.ge.s32.totalorder %s35_s0, 2  ;;  %p113_p2 = scmp.lt.s32.totalorder %s316_s14, 3 }
   0xa   : > { %s377_s0 = smov (%p37_p1, %s35_s0), 0  ;;  %p114_p3 = pnand %p254_p0, %p113_p2 }
   0xb   : > { %s147_s15 = sld [smem:[#allocation3 + %s308_s12]] (!%p114_p3)  ;;  %p138_p4 = scmp.lt.s32.totalorder (!%p114_p3), %s308_s12, 1 }
   0xc   : > { %117 = sbr.rel (%p114_p3) target bundleno = 36 (0x24), region = 24 }
  0x11   : > { %v148_v0 = vlaneseq  ;;  %v152_v2 = vld [vmem:[%s372_s1] sm:$0x1]  ;;  %s255_s18 = sshll.u32 %s147_s15, 1  ;;  %s379_s12 = smov (!%p138_p4, %s308_s12), 1  ;;  %v319_v7 = vmov 0   ;;  %vm165_vm3 = vcmask 1040384  }
  0x12   : > { %v155_v4 = vstv %s255_s18  ;;  %s146_s21 = scalar_lea.vmem %s373_s2, %s379_s12  ;;  %vm166_vm4 = vsmask.f32 256 }
  0x13   : > { %v149_v1 = vshrl.u32 %v148_v0, 7  ;;  %v156_v5 = vsub.s32 %v152_v2, %v155_v4  ;;  %vm167_vm5 = vmand %vm165_vm3, %vm166_vm4  ;;  %v168_v11 = vld [vmem:[%s146_s21] sm:$0x1] }
  0x15   : > { %v153_v3 = vmul.u32 32, %v149_v1 }
  0x17   : > { %v157_v6 = vadd.s32 %v156_v5, %v153_v3 }
  0x19   : > { %vm158_vm0 = vcmp.ge.s32.totalorder %v157_v6, 0  ;;  %vm159_vm1 = vcmp.lt.s32.totalorder %v157_v6, 2 }
  0x1a   : > { %vm160_vm2 = vmand %vm158_vm0, %vm159_vm1 }
  0x1b   : > { %v161_v8 = vsel %vm160_vm2, 1, %v319_v7 }
  0x1c   : > { %v162_v9 = vsub.s32 1, %v161_v8 }
  0x1e   : > { %v163_v10 = vcvt.s32.f32 %v162_v9 }
  0x20   : > { %v164_v12 = vpack.c.bf16 %v163_v10, %v163_v10 }
  0x22   : > { %v169_v13 = vsel %vm167_vm5, %v164_v12, %v168_v11 }
  0x23   : > { %170 = vst [vmem:[%s146_s21] sm:$0x1] %v169_v13 }
  0x24 PF: > { %s16_s14 = sadd.s32 1, %s316_s14   ;;  %s374_s12 = smov %s312_s13 }
  0x25   : > { %p13_p5 = scmp.ge.s32.totalorder %s16_s14, 4   ;;  %s375_s13 = smov %s377_s0 }
  0x27   :  { %15 = sbr.rel (!%p13_p5) target bundleno = 7 (0x7), region = 54 }

</bundles_post_ra>
